<compile_context>
chip_gen: v6e
topology: v6e:2x2x1
jax: 0.10.0
libtpu: 0.0.40
codegen_flags: <defaults>
</compile_context>

<pallas_src>
from functools import partial

import numpy as np
import jax
import jax.numpy as jnp
from jax.experimental import pallas as pl
from jax.experimental.pallas import tpu as pltpu

OUT_PAD = 128  # lane-dense padded output width (last dim multiple of 128)


def qnetwork_kernel(x_ref,      # (T*B, S)    time-major flattened input
                    wih_ref,    # (S, 4H)     LSTM input weights (pre-transposed)
                    whh_ref,    # (H, 4H)     LSTM recurrent weights (pre-transposed)
                    blstm_ref,  # (1, 4H)     b_ih + b_hh (pre-fused)
                    w1_ref,     # (H, H)      fc1 weight (pre-transposed)
                    b1_ref,     # (1, H)
                    w2p_ref,    # (H, OUT_PAD) fc2 weight, zero-padded lanes
                    b2p_ref,    # (1, OUT_PAD) fc2 bias, zero-padded lanes
                    out_ref):   # (B, OUT_PAD)
    TB, S = x_ref.shape
    B = out_ref.shape[0]
    T = TB // B
    H = whh_ref.shape[0]

    # ---- Hoisted input projection: ONE matmul over all timesteps, kept in
    #      vregs (no VMEM scratch; (T*B,4H) f32 is only a few vregs here). ----
    gx = jnp.dot(x_ref[...], wih_ref[...],
                 preferred_element_type=jnp.float32) + blstm_ref[...]   # (T*B,4H)

    whh = whh_ref[...]                                                  # hoisted load

    # ---- Serial recurrence: one dependent matmul + 2 EUP passes per step ----
    # Fully unrolled static loop (small T) -> cross-step LLO scheduling,
    # h/c stay in vregs for the whole recurrence.
    h = jnp.zeros((B, H), jnp.float32)
    c = jnp.zeros((B, H), jnp.float32)
    for t in range(T):  # static unroll
        gates = gx[t * B:(t + 1) * B, :] + jnp.dot(
            h, whh, preferred_element_type=jnp.float32)                 # (B,4H)
        s = jax.nn.sigmoid(gates)            # one EUP pass over all 4H lanes
        i_g = s[:, 0 * H:1 * H]
        f_g = s[:, 1 * H:2 * H]
        o_g = s[:, 3 * H:4 * H]
        g_g = jnp.tanh(gates[:, 2 * H:3 * H])
        c = f_g * c + i_g * g_g
        h = o_g * jnp.tanh(c)

    # ---- Head: fc1 -> relu -> fc2 (lane-dense padded output) ----------------
    fc1 = jnp.maximum(
        jnp.dot(h, w1_ref[...], preferred_element_type=jnp.float32) + b1_ref[...],
        0.0)
    out_ref[...] = (jnp.dot(fc1, w2p_ref[...],
                            preferred_element_type=jnp.float32) + b2p_ref[...])


def prepare_params(params):
    """Pre-transpose / pre-fuse / pre-pad parameters once (not per call)."""
    H = params["w_hh"].shape[1]
    A = params["w_fc2"].shape[0]
    w2_t = jnp.asarray(params["w_fc2"]).T                         # (H, A)
    # Zero-pad fc2 to 128 output lanes -> unmasked lane-dense stores in-kernel.
    w2p = jnp.zeros((H, OUT_PAD), jnp.float32).at[:, :A].set(w2_t)
    b2p = jnp.zeros((1, OUT_PAD), jnp.float32).at[0, :A].set(
        jnp.asarray(params["b_fc2"]))
    fused = {
        "wih_t":  jnp.asarray(params["w_ih"]).T,                  # (S, 4H)
        "whh_t":  jnp.asarray(params["w_hh"]).T,                  # (H, 4H)
        "b_lstm": jnp.asarray(params["b_ih"] + params["b_hh"]).reshape(1, 4 * H),
        "w1_t":   jnp.asarray(params["w_fc1"]).T,                 # (H, H)
        "b1":     jnp.asarray(params["b_fc1"]).reshape(1, H),
        "w2p":    w2p,                                            # (H, OUT_PAD)
        "b2p":    b2p,                                            # (1, OUT_PAD)
    }
    return fused


@partial(jax.jit, static_argnames=("action_size",))
def qnetwork_forward(x, fused, *, action_size):
    """x: (B, T, S) float32  ->  (B, action_size) float32."""
    B, T, S = x.shape
    H = fused["whh_t"].shape[0]

    # Time-major flatten done by XLA on HBM (free/fused), not in-kernel.
    x_flat = jnp.transpose(x, (1, 0, 2)).reshape(T * B, S)        # (T*B, S)

    flops = (2 * T * B * S * 4 * H            # input projection
             + 2 * T * B * H * 4 * H          # recurrent matmuls
             + 2 * B * H * H                  # fc1
             + 2 * B * H * OUT_PAD)           # fc2 (padded)
    transcendentals = T * B * 6 * H           # sigmoid(4H) + tanh(g) + tanh(c)
    bytes_accessed = 4 * (T * B * S + S * 4 * H + H * 4 * H + 4 * H
                          + H * H + H + H * OUT_PAD + OUT_PAD + B * OUT_PAD)

    # Toy sizes fit entirely in VMEM; gridless single TensorCore pass.
    # TODO(synk): at large B, add a leading "parallel" batch-chunk grid axis
    # (megacore on v7x) and tile the hoisted projection over T-chunks so
    # resident scratch fits v7x's 64 MiB VMEM.
    vmem = pl.BlockSpec(memory_space=pltpu.MemorySpace.VMEM)
    out_padded = pl.pallas_call(
        qnetwork_kernel,
        out_shape=jax.ShapeDtypeStruct((B, OUT_PAD), jnp.float32),
        in_specs=[vmem] * 8,
        out_specs=vmem,
        cost_estimate=pl.CostEstimate(flops=flops,
                                      transcendentals=transcendentals,
                                      bytes_accessed=bytes_accessed),
    )(x_flat, fused["wih_t"], fused["whh_t"], fused["b_lstm"],
      fused["w1_t"], fused["b1"], fused["w2p"], fused["b2p"])
    return out_padded[:, :action_size]        # drop zero padding lanes


def jax_reference(x, params):
    """Pure-JAX reference matching torch.nn.LSTM + Linear semantics."""
    B, T, S = x.shape
    H = params["w_hh"].shape[1]
    h = jnp.zeros((B, H), jnp.float32)
    c = jnp.zeros((B, H), jnp.float32)
    for t in range(T):
        g = (x[:, t, :] @ params["w_ih"].T + params["b_ih"]
             + h @ params["w_hh"].T + params["b_hh"])
        i_g = jax.nn.sigmoid(g[:, 0 * H:1 * H])
        f_g = jax.nn.sigmoid(g[:, 1 * H:2 * H])
        g_g = jnp.tanh(g[:, 2 * H:3 * H])
        o_g = jax.nn.sigmoid(g[:, 3 * H:4 * H])
        c = f_g * c + i_g * g_g
        h = o_g * jnp.tanh(c)
    fc1 = jnp.maximum(h @ params["w_fc1"].T + params["b_fc1"], 0.0)
    return fc1 @ params["w_fc2"].T + params["b_fc2"]


def init_params(key, state_size, hidden_size, action_size):
    """Deterministic init matching PyTorch parameter shapes (uniform ±1/sqrt(H))."""
    ks = jax.random.split(key, 8)
    bound = 1.0 / np.sqrt(hidden_size)
    u = lambda k, shp: jax.random.uniform(k, shp, jnp.float32, -bound, bound)
    return {
        "w_ih":  u(ks[0], (4 * hidden_size, state_size)),
        "w_hh":  u(ks[1], (4 * hidden_size, hidden_size)),
        "b_ih":  u(ks[2], (4 * hidden_size,)),
        "b_hh":  u(ks[3], (4 * hidden_size,)),
        "w_fc1": u(ks[4], (hidden_size, hidden_size)),
        "b_fc1": u(ks[5], (hidden_size,)),
        "w_fc2": u(ks[6], (action_size, hidden_size)),
        "b_fc2": u(ks[7], (action_size,)),
    }


if __name__ == "__main__":
    B, T = 2, 8                    # batch, sequence length
    state_size, hidden_size, action_size = 4, 32, 2

    key = jax.random.PRNGKey(0)
    kx, kp = jax.random.split(key)
    x = jax.random.normal(kx, (B, T, state_size), jnp.float32)
    params = init_params(kp, state_size, hidden_size, action_size)
    fused = prepare_params(params)          # one-time param prep

    out = qnetwork_forward(x, fused, action_size=action_size)
    out = jax.block_until_ready(out)

    ref = jax_reference(x, params)
    assert out.shape == (B, action_size)
    assert np.allclose(np.asarray(out), np.asarray(ref), atol=1e-5, rtol=1e-5)

    print("KERNEL_OK")
</pallas_src>

<mosaic_0001>
module attributes {stable_mosaic.version = 11 : i64} {
  func.func @qnetwork_kernel(%arg0: memref<16x4xf32, #tpu.memory_space<vmem>>, %arg1: memref<4x128xf32, #tpu.memory_space<vmem>>, %arg2: memref<32x128xf32, #tpu.memory_space<vmem>>, %arg3: memref<1x128xf32, #tpu.memory_space<vmem>>, %arg4: memref<32x32xf32, #tpu.memory_space<vmem>>, %arg5: memref<1x32xf32, #tpu.memory_space<vmem>>, %arg6: memref<32x128xf32, #tpu.memory_space<vmem>>, %arg7: memref<1x128xf32, #tpu.memory_space<vmem>>, %arg8: memref<2x128xf32, #tpu.memory_space<vmem>>) attributes {dimension_semantics = [], scalar_prefetch = 0 : i64, scratch_operands = 0 : i64, tpu.core_type = #tpu.core_type<tc>} {
    %c0 = arith.constant 0 : index
    %c0_0 = arith.constant 0 : index
    %0 = vector.load %arg0[%c0, %c0_0] : memref<16x4xf32, #tpu.memory_space<vmem>>, vector<16x4xf32>
    %c0_1 = arith.constant 0 : index
    %c0_2 = arith.constant 0 : index
    %1 = vector.load %arg1[%c0_1, %c0_2] : memref<4x128xf32, #tpu.memory_space<vmem>>, vector<4x128xf32>
    %cst = arith.constant dense<0.000000e+00> : vector<16x128xf32>
    %2 = tpu.matmul %0, %1, %cst {dimension_numbers = #tpu.dot_dimension_numbers<[1], [0], [0], [1], [0, 0, 1, 1], [], []>} : vector<16x4xf32>, vector<4x128xf32>, vector<16x128xf32> -> vector<16x128xf32>
    %c0_3 = arith.constant 0 : index
    %c0_4 = arith.constant 0 : index
    %3 = vector.load %arg3[%c0_3, %c0_4] : memref<1x128xf32, #tpu.memory_space<vmem>>, vector<1x128xf32>
    %4 = vector.broadcast %3 : vector<1x128xf32> to vector<16x128xf32>
    %5 = arith.addf %2, %4 : vector<16x128xf32>
    %c0_5 = arith.constant 0 : index
    %c0_6 = arith.constant 0 : index
    %6 = vector.load %arg2[%c0_5, %c0_6] : memref<32x128xf32, #tpu.memory_space<vmem>>, vector<32x128xf32>
    %cst_7 = arith.constant 0.000000e+00 : f32
    %7 = vector.broadcast %cst_7 : f32 to vector<2x32xf32>
    %cst_8 = arith.constant 0.000000e+00 : f32
    %8 = vector.broadcast %cst_8 : f32 to vector<2x32xf32>
    %9 = vector.extract_strided_slice %5 {offsets = [0, 0], sizes = [2, 128], strides = [1, 1]} : vector<16x128xf32> to vector<2x128xf32>
    %cst_9 = arith.constant dense<0.000000e+00> : vector<2x128xf32>
    %10 = tpu.matmul %7, %6, %cst_9 {dimension_numbers = #tpu.dot_dimension_numbers<[1], [0], [0], [1], [0, 0, 1, 1], [], []>} : vector<2x32xf32>, vector<32x128xf32>, vector<2x128xf32> -> vector<2x128xf32>
    %11 = arith.addf %9, %10 : vector<2x128xf32>
    %12 = arith.negf %11 : vector<2x128xf32>
    %13 = math.exp %12 : vector<2x128xf32>
    %cst_10 = arith.constant 1.000000e+00 : f32
    %14 = vector.broadcast %cst_10 : f32 to vector<2x128xf32>
    %15 = arith.addf %14, %13 : vector<2x128xf32>
    %16 = arith.divf %14, %15 : vector<2x128xf32>
    %17 = vector.extract_strided_slice %16 {offsets = [0, 0], sizes = [2, 32], strides = [1, 1]} : vector<2x128xf32> to vector<2x32xf32>
    %18 = vector.extract_strided_slice %16 {offsets = [0, 32], sizes = [2, 32], strides = [1, 1]} : vector<2x128xf32> to vector<2x32xf32>
    %19 = vector.extract_strided_slice %16 {offsets = [0, 96], sizes = [2, 32], strides = [1, 1]} : vector<2x128xf32> to vector<2x32xf32>
    %20 = vector.extract_strided_slice %11 {offsets = [0, 64], sizes = [2, 32], strides = [1, 1]} : vector<2x128xf32> to vector<2x32xf32>
    %21 = math.tanh %20 : vector<2x32xf32>
    %22 = arith.mulf %18, %8 : vector<2x32xf32>
    %23 = arith.mulf %17, %21 : vector<2x32xf32>
    %24 = arith.addf %22, %23 : vector<2x32xf32>
    %25 = math.tanh %24 : vector<2x32xf32>
    %26 = arith.mulf %19, %25 : vector<2x32xf32>
    %27 = vector.extract_strided_slice %5 {offsets = [2, 0], sizes = [2, 128], strides = [1, 1]} : vector<16x128xf32> to vector<2x128xf32>
    %cst_11 = arith.constant dense<0.000000e+00> : vector<2x128xf32>
    %28 = tpu.matmul %26, %6, %cst_11 {dimension_numbers = #tpu.dot_dimension_numbers<[1], [0], [0], [1], [0, 0, 1, 1], [], []>} : vector<2x32xf32>, vector<32x128xf32>, vector<2x128xf32> -> vector<2x128xf32>
    %29 = arith.addf %27, %28 : vector<2x128xf32>
    %30 = arith.negf %29 : vector<2x128xf32>
    %31 = math.exp %30 : vector<2x128xf32>
    %cst_12 = arith.constant 1.000000e+00 : f32
    %32 = vector.broadcast %cst_12 : f32 to vector<2x128xf32>
    %33 = arith.addf %32, %31 : vector<2x128xf32>
    %34 = arith.divf %32, %33 : vector<2x128xf32>
    %35 = vector.extract_strided_slice %34 {offsets = [0, 0], sizes = [2, 32], strides = [1, 1]} : vector<2x128xf32> to vector<2x32xf32>
    %36 = vector.extract_strided_slice %34 {offsets = [0, 32], sizes = [2, 32], strides = [1, 1]} : vector<2x128xf32> to vector<2x32xf32>
    %37 = vector.extract_strided_slice %34 {offsets = [0, 96], sizes = [2, 32], strides = [1, 1]} : vector<2x128xf32> to vector<2x32xf32>
    %38 = vector.extract_strided_slice %29 {offsets = [0, 64], sizes = [2, 32], strides = [1, 1]} : vector<2x128xf32> to vector<2x32xf32>
    %39 = math.tanh %38 : vector<2x32xf32>
    %40 = arith.mulf %36, %24 : vector<2x32xf32>
    %41 = arith.mulf %35, %39 : vector<2x32xf32>
    %42 = arith.addf %40, %41 : vector<2x32xf32>
    %43 = math.tanh %42 : vector<2x32xf32>
    %44 = arith.mulf %37, %43 : vector<2x32xf32>
    %45 = vector.extract_strided_slice %5 {offsets = [4, 0], sizes = [2, 128], strides = [1, 1]} : vector<16x128xf32> to vector<2x128xf32>
    %cst_13 = arith.constant dense<0.000000e+00> : vector<2x128xf32>
    %46 = tpu.matmul %44, %6, %cst_13 {dimension_numbers = #tpu.dot_dimension_numbers<[1], [0], [0], [1], [0, 0, 1, 1], [], []>} : vector<2x32xf32>, vector<32x128xf32>, vector<2x128xf32> -> vector<2x128xf32>
    %47 = arith.addf %45, %46 : vector<2x128xf32>
    %48 = arith.negf %47 : vector<2x128xf32>
    %49 = math.exp %48 : vector<2x128xf32>
    %cst_14 = arith.constant 1.000000e+00 : f32
    %50 = vector.broadcast %cst_14 : f32 to vector<2x128xf32>
    %51 = arith.addf %50, %49 : vector<2x128xf32>
    %52 = arith.divf %50, %51 : vector<2x128xf32>
    %53 = vector.extract_strided_slice %52 {offsets = [0, 0], sizes = [2, 32], strides = [1, 1]} : vector<2x128xf32> to vector<2x32xf32>
    %54 = vector.extract_strided_slice %52 {offsets = [0, 32], sizes = [2, 32], strides = [1, 1]} : vector<2x128xf32> to vector<2x32xf32>
    %55 = vector.extract_strided_slice %52 {offsets = [0, 96], sizes = [2, 32], strides = [1, 1]} : vector<2x128xf32> to vector<2x32xf32>
    %56 = vector.extract_strided_slice %47 {offsets = [0, 64], sizes = [2, 32], strides = [1, 1]} : vector<2x128xf32> to vector<2x32xf32>
    %57 = math.tanh %56 : vector<2x32xf32>
    %58 = arith.mulf %54, %42 : vector<2x32xf32>
    %59 = arith.mulf %53, %57 : vector<2x32xf32>
    %60 = arith.addf %58, %59 : vector<2x32xf32>
    %61 = math.tanh %60 : vector<2x32xf32>
    %62 = arith.mulf %55, %61 : vector<2x32xf32>
    %63 = vector.extract_strided_slice %5 {offsets = [6, 0], sizes = [2, 128], strides = [1, 1]} : vector<16x128xf32> to vector<2x128xf32>
    %cst_15 = arith.constant dense<0.000000e+00> : vector<2x128xf32>
    %64 = tpu.matmul %62, %6, %cst_15 {dimension_numbers = #tpu.dot_dimension_numbers<[1], [0], [0], [1], [0, 0, 1, 1], [], []>} : vector<2x32xf32>, vector<32x128xf32>, vector<2x128xf32> -> vector<2x128xf32>
    %65 = arith.addf %63, %64 : vector<2x128xf32>
    %66 = arith.negf %65 : vector<2x128xf32>
    %67 = math.exp %66 : vector<2x128xf32>
    %cst_16 = arith.constant 1.000000e+00 : f32
    %68 = vector.broadcast %cst_16 : f32 to vector<2x128xf32>
    %69 = arith.addf %68, %67 : vector<2x128xf32>
    %70 = arith.divf %68, %69 : vector<2x128xf32>
    %71 = vector.extract_strided_slice %70 {offsets = [0, 0], sizes = [2, 32], strides = [1, 1]} : vector<2x128xf32> to vector<2x32xf32>
    %72 = vector.extract_strided_slice %70 {offsets = [0, 32], sizes = [2, 32], strides = [1, 1]} : vector<2x128xf32> to vector<2x32xf32>
    %73 = vector.extract_strided_slice %70 {offsets = [0, 96], sizes = [2, 32], strides = [1, 1]} : vector<2x128xf32> to vector<2x32xf32>
    %74 = vector.extract_strided_slice %65 {offsets = [0, 64], sizes = [2, 32], strides = [1, 1]} : vector<2x128xf32> to vector<2x32xf32>
    %75 = math.tanh %74 : vector<2x32xf32>
    %76 = arith.mulf %72, %60 : vector<2x32xf32>
    %77 = arith.mulf %71, %75 : vector<2x32xf32>
    %78 = arith.addf %76, %77 : vector<2x32xf32>
    %79 = math.tanh %78 : vector<2x32xf32>
    %80 = arith.mulf %73, %79 : vector<2x32xf32>
    %81 = vector.extract_strided_slice %5 {offsets = [8, 0], sizes = [2, 128], strides = [1, 1]} : vector<16x128xf32> to vector<2x128xf32>
    %cst_17 = arith.constant dense<0.000000e+00> : vector<2x128xf32>
    %82 = tpu.matmul %80, %6, %cst_17 {dimension_numbers = #tpu.dot_dimension_numbers<[1], [0], [0], [1], [0, 0, 1, 1], [], []>} : vector<2x32xf32>, vector<32x128xf32>, vector<2x128xf32> -> vector<2x128xf32>
    %83 = arith.addf %81, %82 : vector<2x128xf32>
    %84 = arith.negf %83 : vector<2x128xf32>
    %85 = math.exp %84 : vector<2x128xf32>
    %cst_18 = arith.constant 1.000000e+00 : f32
    %86 = vector.broadcast %cst_18 : f32 to vector<2x128xf32>
    %87 = arith.addf %86, %85 : vector<2x128xf32>
    %88 = arith.divf %86, %87 : vector<2x128xf32>
    %89 = vector.extract_strided_slice %88 {offsets = [0, 0], sizes = [2, 32], strides = [1, 1]} : vector<2x128xf32> to vector<2x32xf32>
    %90 = vector.extract_strided_slice %88 {offsets = [0, 32], sizes = [2, 32], strides = [1, 1]} : vector<2x128xf32> to vector<2x32xf32>
    %91 = vector.extract_strided_slice %88 {offsets = [0, 96], sizes = [2, 32], strides = [1, 1]} : vector<2x128xf32> to vector<2x32xf32>
    %92 = vector.extract_strided_slice %83 {offsets = [0, 64], sizes = [2, 32], strides = [1, 1]} : vector<2x128xf32> to vector<2x32xf32>
    %93 = math.tanh %92 : vector<2x32xf32>
    %94 = arith.mulf %90, %78 : vector<2x32xf32>
    %95 = arith.mulf %89, %93 : vector<2x32xf32>
    %96 = arith.addf %94, %95 : vector<2x32xf32>
    %97 = math.tanh %96 : vector<2x32xf32>
    %98 = arith.mulf %91, %97 : vector<2x32xf32>
    %99 = vector.extract_strided_slice %5 {offsets = [10, 0], sizes = [2, 128], strides = [1, 1]} : vector<16x128xf32> to vector<2x128xf32>
    %cst_19 = arith.constant dense<0.000000e+00> : vector<2x128xf32>
    %100 = tpu.matmul %98, %6, %cst_19 {dimension_numbers = #tpu.dot_dimension_numbers<[1], [0], [0], [1], [0, 0, 1, 1], [], []>} : vector<2x32xf32>, vector<32x128xf32>, vector<2x128xf32> -> vector<2x128xf32>
    %101 = arith.addf %99, %100 : vector<2x128xf32>
    %102 = arith.negf %101 : vector<2x128xf32>
    %103 = math.exp %102 : vector<2x128xf32>
    %cst_20 = arith.constant 1.000000e+00 : f32
    %104 = vector.broadcast %cst_20 : f32 to vector<2x128xf32>
    %105 = arith.addf %104, %103 : vector<2x128xf32>
    %106 = arith.divf %104, %105 : vector<2x128xf32>
    %107 = vector.extract_strided_slice %106 {offsets = [0, 0], sizes = [2, 32], strides = [1, 1]} : vector<2x128xf32> to vector<2x32xf32>
    %108 = vector.extract_strided_slice %106 {offsets = [0, 32], sizes = [2, 32], strides = [1, 1]} : vector<2x128xf32> to vector<2x32xf32>
    %109 = vector.extract_strided_slice %106 {offsets = [0, 96], sizes = [2, 32], strides = [1, 1]} : vector<2x128xf32> to vector<2x32xf32>
    %110 = vector.extract_strided_slice %101 {offsets = [0, 64], sizes = [2, 32], strides = [1, 1]} : vector<2x128xf32> to vector<2x32xf32>
    %111 = math.tanh %110 : vector<2x32xf32>
    %112 = arith.mulf %108, %96 : vector<2x32xf32>
    %113 = arith.mulf %107, %111 : vector<2x32xf32>
    %114 = arith.addf %112, %113 : vector<2x32xf32>
    %115 = math.tanh %114 : vector<2x32xf32>
    %116 = arith.mulf %109, %115 : vector<2x32xf32>
    %117 = vector.extract_strided_slice %5 {offsets = [12, 0], sizes = [2, 128], strides = [1, 1]} : vector<16x128xf32> to vector<2x128xf32>
    %cst_21 = arith.constant dense<0.000000e+00> : vector<2x128xf32>
    %118 = tpu.matmul %116, %6, %cst_21 {dimension_numbers = #tpu.dot_dimension_numbers<[1], [0], [0], [1], [0, 0, 1, 1], [], []>} : vector<2x32xf32>, vector<32x128xf32>, vector<2x128xf32> -> vector<2x128xf32>
    %119 = arith.addf %117, %118 : vector<2x128xf32>
    %120 = arith.negf %119 : vector<2x128xf32>
    %121 = math.exp %120 : vector<2x128xf32>
    %cst_22 = arith.constant 1.000000e+00 : f32
    %122 = vector.broadcast %cst_22 : f32 to vector<2x128xf32>
    %123 = arith.addf %122, %121 : vector<2x128xf32>
    %124 = arith.divf %122, %123 : vector<2x128xf32>
    %125 = vector.extract_strided_slice %124 {offsets = [0, 0], sizes = [2, 32], strides = [1, 1]} : vector<2x128xf32> to vector<2x32xf32>
    %126 = vector.extract_strided_slice %124 {offsets = [0, 32], sizes = [2, 32], strides = [1, 1]} : vector<2x128xf32> to vector<2x32xf32>
    %127 = vector.extract_strided_slice %124 {offsets = [0, 96], sizes = [2, 32], strides = [1, 1]} : vector<2x128xf32> to vector<2x32xf32>
    %128 = vector.extract_strided_slice %119 {offsets = [0, 64], sizes = [2, 32], strides = [1, 1]} : vector<2x128xf32> to vector<2x32xf32>
    %129 = math.tanh %128 : vector<2x32xf32>
    %130 = arith.mulf %126, %114 : vector<2x32xf32>
    %131 = arith.mulf %125, %129 : vector<2x32xf32>
    %132 = arith.addf %130, %131 : vector<2x32xf32>
    %133 = math.tanh %132 : vector<2x32xf32>
    %134 = arith.mulf %127, %133 : vector<2x32xf32>
    %135 = vector.extract_strided_slice %5 {offsets = [14, 0], sizes = [2, 128], strides = [1, 1]} : vector<16x128xf32> to vector<2x128xf32>
    %cst_23 = arith.constant dense<0.000000e+00> : vector<2x128xf32>
    %136 = tpu.matmul %134, %6, %cst_23 {dimension_numbers = #tpu.dot_dimension_numbers<[1], [0], [0], [1], [0, 0, 1, 1], [], []>} : vector<2x32xf32>, vector<32x128xf32>, vector<2x128xf32> -> vector<2x128xf32>
    %137 = arith.addf %135, %136 : vector<2x128xf32>
    %138 = arith.negf %137 : vector<2x128xf32>
    %139 = math.exp %138 : vector<2x128xf32>
    %cst_24 = arith.constant 1.000000e+00 : f32
    %140 = vector.broadcast %cst_24 : f32 to vector<2x128xf32>
    %141 = arith.addf %140, %139 : vector<2x128xf32>
    %142 = arith.divf %140, %141 : vector<2x128xf32>
    %143 = vector.extract_strided_slice %142 {offsets = [0, 0], sizes = [2, 32], strides = [1, 1]} : vector<2x128xf32> to vector<2x32xf32>
    %144 = vector.extract_strided_slice %142 {offsets = [0, 32], sizes = [2, 32], strides = [1, 1]} : vector<2x128xf32> to vector<2x32xf32>
    %145 = vector.extract_strided_slice %142 {offsets = [0, 96], sizes = [2, 32], strides = [1, 1]} : vector<2x128xf32> to vector<2x32xf32>
    %146 = vector.extract_strided_slice %137 {offsets = [0, 64], sizes = [2, 32], strides = [1, 1]} : vector<2x128xf32> to vector<2x32xf32>
    %147 = math.tanh %146 : vector<2x32xf32>
    %148 = arith.mulf %144, %132 : vector<2x32xf32>
    %149 = arith.mulf %143, %147 : vector<2x32xf32>
    %150 = arith.addf %148, %149 : vector<2x32xf32>
    %151 = math.tanh %150 : vector<2x32xf32>
    %152 = arith.mulf %145, %151 : vector<2x32xf32>
    %c0_25 = arith.constant 0 : index
    %c0_26 = arith.constant 0 : index
    %153 = vector.load %arg4[%c0_25, %c0_26] : memref<32x32xf32, #tpu.memory_space<vmem>>, vector<32x32xf32>
    %cst_27 = arith.constant dense<0.000000e+00> : vector<2x32xf32>
    %154 = tpu.matmul %152, %153, %cst_27 {dimension_numbers = #tpu.dot_dimension_numbers<[1], [0], [0], [1], [0, 0, 1, 1], [], []>} : vector<2x32xf32>, vector<32x32xf32>, vector<2x32xf32> -> vector<2x32xf32>
    %c0_28 = arith.constant 0 : index
    %c0_29 = arith.constant 0 : index
    %155 = vector.load %arg5[%c0_28, %c0_29] : memref<1x32xf32, #tpu.memory_space<vmem>>, vector<1x32xf32>
    %156 = vector.broadcast %155 : vector<1x32xf32> to vector<2x32xf32>
    %157 = arith.addf %154, %156 : vector<2x32xf32>
    %cst_30 = arith.constant 0.000000e+00 : f32
    %158 = vector.broadcast %cst_30 : f32 to vector<2x32xf32>
    %159 = arith.maximumf %157, %158 : vector<2x32xf32>
    %c0_31 = arith.constant 0 : index
    %c0_32 = arith.constant 0 : index
    %160 = vector.load %arg6[%c0_31, %c0_32] : memref<32x128xf32, #tpu.memory_space<vmem>>, vector<32x128xf32>
    %cst_33 = arith.constant dense<0.000000e+00> : vector<2x128xf32>
    %161 = tpu.matmul %159, %160, %cst_33 {dimension_numbers = #tpu.dot_dimension_numbers<[1], [0], [0], [1], [0, 0, 1, 1], [], []>} : vector<2x32xf32>, vector<32x128xf32>, vector<2x128xf32> -> vector<2x128xf32>
    %c0_34 = arith.constant 0 : index
    %c0_35 = arith.constant 0 : index
    %162 = vector.load %arg7[%c0_34, %c0_35] : memref<1x128xf32, #tpu.memory_space<vmem>>, vector<1x128xf32>
    %163 = vector.broadcast %162 : vector<1x128xf32> to vector<2x128xf32>
    %164 = arith.addf %161, %163 : vector<2x128xf32>
    %c0_36 = arith.constant 0 : index
    %c0_37 = arith.constant 0 : index
    %165 = vector.load %arg8[%c0_36, %c0_37] : memref<2x128xf32, #tpu.memory_space<vmem>>, vector<2x128xf32>
    tpu.vector_store %arg8[%c0_36, %c0_37], %164 {strides = array<i32>} : memref<2x128xf32, #tpu.memory_space<vmem>>, vector<2x128xf32>,
    return
  }
}

</mosaic_0001>

<bundles_post_ra>
// kernel: qnetwork_forward.1
= control target key start
LH: loop header
LB: loop body
LE: loop exit
PB: predicated region body
PF: predicated region fallthrough
CT: control target
= control target key end

     0   :  { %13 = vsyncpa [#allocation3], 0  ;;  %s1800_s0 = inlined_call_operand.vmem [shape: f32[16,4], index: 0, kind: input, shape index: {}]   ;;  %s1801_s1 = inlined_call_operand.vmem [shape: f32[4,128], index: 1, kind: input, shape index: {}]   ;;  %s1802_s2 = inlined_call_operand.vmem [shape: f32[32,128], index: 2, kind: input, shape index: {}]   ;;  %s1803_s3 = inlined_call_operand.vmem [shape: f32[1,128], index: 3, kind: input, shape index: {}]   ;;  %s1804_s4 = inlined_call_operand.hbm [shape: f32[32,32], index: 4, kind: input, shape index: {}]   ;;  %s1805_s5 = inlined_call_operand.vmem [shape: f32[1,32], index: 5, kind: input, shape index: {}]   ;;  %s1806_s6 = inlined_call_operand.hbm [shape: f32[32,128], index: 6, kind: input, shape index: {}]   ;;  %s1807_s7 = inlined_call_operand.hbm [shape: f32[1,128], index: 7, kind: input, shape index: {}]   ;;  %s1808_s8 = inlined_call_operand.hbm [shape: f32[2,128], index: 8, kind: output, shape index: {}]  }
   0x1   :  { %14 = vsyncpa [#allocation6], 0 }
   0x2   :  { %15 = vsyncpa [#allocation4], 0  ;;  %s1552_s27 = smov [#allocation5]   ;;  %s1553_s29 = smov [#allocation2]  }
   0x3   :  { %s43_s28 = sshll.u32 %s1552_s27, 4  ;;  %s29_s30 = sshll.u32 %s1553_s29, 4  ;;  %s44_s28 = int_to_ptr.vmem [resolvable:$true] %s43_s28  ;;  %s30_s30 = int_to_ptr.vmem [resolvable:$true] %s29_s30 }
   0x4   :  { %s1474_s9 = scalar_lea.vmem %s44_s28, 512  ;;  %p1479_p1 = scmp.lt.s32.totalorder %s44_s28, %s44_s28 }
   0x5   :  { %p1475_p0 = scmp.ne.s32.totalorder %s44_s28, %s1474_s9  ;;  %p1480_p2 = scmp.lt.s32.totalorder %s1474_s9, %s1474_s9 }
   0x7   :  { %p1481_p3 = por %p1480_p2, %p1479_p1 }
   0x9   :  { %p1482_p4 = pnand %p1481_p3, %p1475_p0 }
   0xb   :  { %1485 = shalt.err (!%p1482_p4)
}
   0xc   :  { %s1554_s10 = smov 128   ;;  %s1555_s11 = smov 8  }
   0xd   :  { %49 = dma.hbm_to_vmem [thread:$0]  %s1806_s6, 512, %s44_s28, [#allocation6], %s1554_s10, %s1554_s10, %s1555_s11  }
   0xe   :  { %s1494_s14 = scalar_lea.vmem %s30_s30, 512  ;;  %p1499_p6 = scmp.lt.s32.totalorder %s30_s30, %s30_s30 }
   0xf   :  { %p1495_p5 = scmp.ne.s32.totalorder %s30_s30, %s1494_s14  ;;  %p1500_p7 = scmp.lt.s32.totalorder %s1494_s14, %s1494_s14 }
  0x11   :  { %p1501_p8 = por %p1500_p7, %p1499_p6 }
  0x13   :  { %p1502_p9 = pnand %p1501_p8, %p1495_p5 }
  0x15   :  { %1505 = shalt.err (!%p1502_p9)
}
  0x16   :  { %35 = dma.hbm_to_vmem [thread:$0]  %s1804_s4, 512, %s30_s30, [#allocation3], %s1554_s10, %s1554_s10, %s1555_s11  }
  0x17   :  { %s1556_s17 = smov [#allocation7]  }
  0x18   :  { %s56_s18 = sshll.u32 %s1556_s17, 4  ;;  %s57_s18 = int_to_ptr.vmem [resolvable:$true] %s56_s18 }
  0x19   :  { %s1514_s19 = scalar_lea.vmem %s57_s18, 16  ;;  %s1518_s20 = scalar_lea.vmem %s57_s18, 32 }
  0x1a   :  { %p1515_p10 = scmp.ne.s32.totalorder %s57_s18, %s1514_s19  ;;  %p1519_p11 = scmp.lt.s32.totalorder %s57_s18, %s57_s18 }
  0x1b   :  { %p1520_p12 = scmp.lt.s32.totalorder %s1518_s20, %s1514_s19 }
  0x1d   :  { %p1521_p13 = por %p1520_p12, %p1519_p11 }
  0x1f   :  { %p1522_p0 = pnand %p1521_p13, %p1515_p10 }
  0x21   :  { %1525 = shalt.err (!%p1522_p0)
}
  0x22   :  { %59 = dma.hbm_to_vmem [thread:$0]  %s1807_s7, 16, %s57_s18, [#allocation6]  }
  0x23   :  { %1546 = dma.done.wait [#allocation3], 512  }
  0x24   :  { %1547 = vsyncadd [#allocation3], 4294966784 }
  0x25   :  { %1548 = dma.done.wait [#allocation6], 528  }
  0x26   :  { %1549 = vsyncadd [#allocation6], 4294966768  ;;  %v1557_v0 = vmov 0.0   ;;  %vm1558_vm0 = vmmov 0   ;;  %vm86_vm1 = vcmask 1043456   ;;  %vm79_vm2 = vcmask 31744  }
  0x27   :  { %1282 = vmatprep.subr.mxu1 %v1557_v0  ;;  %1290 = vmatprep.mubr.msk.f32.mxu1 %vm1558_vm0, %v1557_v0  ;;  %v71_v1 = vld [vmem:[%s1801_s1] sm:$0xf]  ;;  %v1625_v2 = vld [vmem:[%s1802_s2 + $0x18] sm:$0xff]  ;;  %v70_v4 = vld [vmem:[%s1800_s0 + $0x8] sm:$0xff]  ;;  %s1559_s11 = smov 64   ;;  %vm169_vm3 = vcmask 261120  }
  0x28   :  { %v69_v3 = vld [vmem:[%s1800_s0] sm:$0xff]  ;;  %1277 = vmatprep.subr.msk.mxu0 %vm86_vm1, %v71_v1  ;;  %1283 = vmatpush3.msra.mxu1 %v1625_v2  ;;  %v1637_v5 = vld [vmem:[%s1802_s2 + $0x10] sm:$0xff]  ;;  %v1643_v6 = vld [vmem:[%s1802_s2 + $0x8] sm:$0xff]  ;;  %s1561_s14 = smov [#allocation8]  }
  0x29   :  { %1278 = vmatpush3.msk.msra.mxu0 %vm86_vm1, %v71_v1  ;;  %1279 = vmatprep.mubr.msk.f32.mxu0 %vm79_vm2, %v69_v3  ;;  %v1651_v7 = vld [vmem:[%s1802_s2] sm:$0xff]  ;;  %s1191_s15 = sshll.u32 %s1561_s14, 4  ;;  %s1192_s15 = int_to_ptr.vmem [resolvable:$true] %s1191_s15 }
  0x2a   :  { %1284 = vmatprep.subr.mxu1 %v1557_v0  ;;  %1280 = vmatmul.mubr.msk.f32.vlgmr.msra.gmra.mxu0 %vm79_vm2, %v70_v4  ;;  %v1201_v8 = vld [vmem:[%s1803_s3] ss:$0 sm:$0xff]  ;;  %s1560_s3 = smov 32   ;;  %s1526_s16 = scalar_lea.vmem %s1192_s15, 32 }
  0x2b   :  { %1285 = vmatpush3.msra.mxu1 %v1637_v5  ;;  %1293 = vmatprep.subr.mxu0 %v1557_v0  ;;  %p1527_p1 = scmp.ne.s32.totalorder %s1192_s15, %s1526_s16  ;;  %p1531_p2 = scmp.lt.s32.totalorder %s1192_s15, %s1192_s15 }
  0x2c   :  { %1286 = vmatprep.subr.mxu1 %v1557_v0  ;;  %1294 = vmatpush3.msra.mxu0 %v1625_v2  ;;  %p1532_p3 = scmp.lt.s32.totalorder %s1526_s16, %s1526_s16 }
  0x2d   :  { %1287 = vmatpush3.msra.mxu1 %v1643_v6  ;;  %1295 = vmatprep.subr.mxu0 %v1557_v0 }
  0x2e   :  { %1288 = vmatprep.subr.mxu1 %v1557_v0  ;;  %1296 = vmatpush3.msra.mxu0 %v1637_v5  ;;  %p1533_p4 = por %p1532_p3, %p1531_p2 }
  0x2f   :  { %1289 = vmatpush3.msra.mxu1 %v1651_v7  ;;  %1297 = vmatprep.subr.mxu0 %v1557_v0 }
  0x30   :  { %1291 = vmatmul.mubr.f32.vlgmr.msra.gmra.mxu1 %v1557_v0  ;;  %1298 = vmatpush3.msra.mxu0 %v1643_v6  ;;  %p1534_p5 = pnand %p1533_p4, %p1527_p1 }
  0x31   :  { %1299 = vmatprep.subr.mxu0 %v1557_v0  ;;  %1301 = vmatprep.mubr.msk.f32.mxu0 %vm1558_vm0, %v1557_v0 }
  0x32   :  { %1300 = vmatpush3.msra.mxu0 %v1651_v7  ;;  %1304 = vmatprep.subr.mxu1 %v1557_v0 }
  0x33   :  { %1305 = vmatpush3.msra.mxu1 %v1625_v2  ;;  %1312 = vmatprep.mubr.msk.f32.mxu1 %vm1558_vm0, %v1557_v0 }
  0x34   :  { %1306 = vmatprep.subr.mxu1 %v1557_v0  ;;  %1315 = vmatprep.subr.mxu0 %v1557_v0 }
  0x35   :  { %1307 = vmatpush3.msra.mxu1 %v1637_v5 }
  0x36   :  { %1308 = vmatprep.subr.mxu1 %v1557_v0 }
  0x37   :  { %1309 = vmatpush3.msra.mxu1 %v1643_v6 }
  0x38   :  { %1310 = vmatprep.subr.mxu1 %v1557_v0 }
  0x39   :  { %1311 = vmatpush3.msra.mxu1 %v1651_v7 }
  0x3a   :  { %1326 = vmatprep.subr.mxu1 %v1557_v0 }
  0xea   :  { %v1281_v9 = vpop.f32.mrf.mxu0 }
  0xeb   :  { %v1681_v10 = vadd.f32 %v1281_v9, %v1201_v8 }
  0xec   :  { %v156_v11 = vpop.f32.mrf.mxu0 }
  0xed   :  { %v1683_v12 = vadd.f32 %v1201_v8, %v156_v11 }
  0xf0   :  { %v239_v13 = vpop.f32.mrf.mxu1 }
  0xf1   :  { %v243_v14 = vadd.f32 %v239_v13, %v1683_v12 }
  0xf2   :  { %v1292_v15 = vpop.f32.mrf.mxu1 }
  0xf3   :  { %1402 = vtanh.f32 %v243_v14  ;;  %v1205_v17 = vmul.f32 -1.442695, %v243_v14 }
  0xf5   :  { %1404 = vpow2.f32 %v1205_v17 }
 0x100   :  { %v1403_v16 = vpop.eup %1402 }
 0x101   :  { %253 = vrot.lane.b32.xlu0 %v1403_v16, %s1559_s11 }
 0x102   :  { %v1405_v18 = vpop.eup %1404 }
 0x103   :  { %v247_v19 = vadd.f32 1.0, %v1405_v18 }
 0x105   :  { %1406 = vrcp.f32 %v247_v19 }
 0x112   :  { %v1407_v20 = vpop.eup %1406 }
 0x113   :  { %v251_v23 = vmul.f32 0.0, %v1407_v20 }
 0x173   :  { %v254_v21 = vpop.permute.xlu0 %253 }
 0x174   :  { %v256_v22 = vmul.f32 %v1407_v20, %v254_v21 }
 0x176   :  { %258 = vrot.lane.b32.xlu0 %v256_v22, %s1560_s3 }
 0x1e8   :  { %v259_v24 = vpop.permute.xlu0 %258 }
 0x1e9   :  { %v261_v25 = vadd.f32 %v259_v24, %v251_v23 }
 0x1eb   :  { %1408 = vtanh.f32 %v261_v25  ;;  %v355_v41 = vrot.slane %v261_v25, 6 }
 0x1f8   :  { %v1409_v26 = vpop.eup %1408 }
 0x1f9   :  { %264 = vrot.lane.b32.xlu1 %v1409_v26, %s1559_s11 }
 0x26b   :  { %v265_v27 = vpop.permute.xlu1 %264 }
 0x26c   :  { %v267_v28 = vmul.f32 %v1407_v20, %v265_v27 }
 0x26e   :  { %269 = vrot.lane.b32.xlu1 %v267_v28, %s1560_s3 }
 0x2e0   :  { %v270_v29 = vpop.permute.xlu1 %269 }
 0x2e1   :  { %1302 = vmatmul.mubr.msk.f32.vlgmr.msra.gmra.mxu0 %vm169_vm3, %v270_v29 }
 0x2e2   :  { %1316 = vmatpush3.msra.mxu0 %v1625_v2  ;;  %1323 = vmatprep.mubr.msk.f32.mxu0 %vm1558_vm0, %v1557_v0 }
 0x2e3   :  { %1317 = vmatprep.subr.mxu0 %v1557_v0 }
 0x2e4   :  { %1318 = vmatpush3.msra.mxu0 %v1637_v5 }
 0x2e5   :  { %1319 = vmatprep.subr.mxu0 %v1557_v0 }
 0x2e6   :  { %1320 = vmatpush3.msra.mxu0 %v1643_v6 }
 0x2e7   :  { %1321 = vmatprep.subr.mxu0 %v1557_v0 }
 0x2e8   :  { %1322 = vmatpush3.msra.mxu0 %v1651_v7 }
 0x2e9   :  { %1337 = vmatprep.subr.mxu0 %v1557_v0 }
 0x3a1   :  { %v339_v30 = vpop.f32.mrf.mxu0 }
 0x3a2   :  { %v344_v31 = vrot.slane %v339_v30, 6 }
 0x3a3   :  { %v1303_v32 = vpop.f32.mrf.mxu0 }
 0x3a4   :  { %v346_v33 = vadd.f32 %v344_v31, %v1683_v12 }
 0x3a6   :  { %1410 = vtanh.f32 %v346_v33  ;;  %v1207_v35 = vmul.f32 -1.442695, %v346_v33 }
 0x3a8   :  { %1412 = vpow2.f32 %v1207_v35 }
 0x3b3   :  { %v1411_v34 = vpop.eup %1410 }
 0x3b4   :  { %359 = vrot.lane.b32.xlu0 %v1411_v34, %s1559_s11 }
 0x3b5   :  { %v1413_v36 = vpop.eup %1412 }
 0x3b6   :  { %v350_v37 = vadd.f32 1.0, %v1413_v36 }
 0x3b8   :  { %1414 = vrcp.f32 %v350_v37 }
 0x3c5   :  { %v1415_v38 = vpop.eup %1414 }
 0x3c6   :  { %v357_v42 = vmul.f32 %v1415_v38, %v355_v41 }
 0x426   :  { %v360_v39 = vpop.permute.xlu0 %359 }
 0x427   :  { %v362_v40 = vmul.f32 %v1415_v38, %v360_v39 }
 0x429   :  { %364 = vrot.lane.b32.xlu1 %v362_v40, %s1560_s3 }
 0x49b   :  { %v365_v43 = vpop.permute.xlu1 %364 }
 0x49c   :  { %v367_v44 = vadd.f32 %v365_v43, %v357_v42 }
 0x49e   :  { %1416 = vtanh.f32 %v367_v44  ;;  %v462_v61 = vrot.slane %v367_v44, 6 }
 0x4ab   :  { %v1417_v45 = vpop.eup %1416 }
 0x4ac   :  { %370 = vrot.lane.b32.xlu0 %v1417_v45, %s1559_s11 }
 0x51e   :  { %v371_v46 = vpop.permute.xlu0 %370 }
 0x51f   :  { %v373_v47 = vmul.f32 %v1415_v38, %v371_v46 }
 0x521   :  { %v375_v48 = vrot.slane %v373_v47, 2 }
 0x523   :  { %376 = vrot.lane.b32.xlu1 %v375_v48, %s1560_s3 }
 0x595   :  { %v377_v49 = vpop.permute.xlu1 %376 }
 0x596   :  { %1313 = vmatmul.mubr.msk.f32.vlgmr.msra.gmra.mxu1 %vm169_vm3, %v377_v49 }
 0x597   :  { %1327 = vmatpush3.msra.mxu1 %v1625_v2  ;;  %1334 = vmatprep.mubr.msk.f32.mxu1 %vm1558_vm0, %v1557_v0 }
 0x598   :  { %1328 = vmatprep.subr.mxu1 %v1557_v0 }
 0x599   :  { %1329 = vmatpush3.msra.mxu1 %v1637_v5 }
 0x59a   :  { %1330 = vmatprep.subr.mxu1 %v1557_v0 }
 0x59b   :  { %1331 = vmatpush3.msra.mxu1 %v1643_v6 }
 0x59c   :  { %1332 = vmatprep.subr.mxu1 %v1557_v0 }
 0x59d   :  { %1333 = vmatpush3.msra.mxu1 %v1651_v7 }
 0x59e   :  { %1348 = vmatprep.subr.mxu1 %v1557_v0 }
 0x656   :  { %v446_v50 = vpop.f32.mrf.mxu1 }
 0x657   :  { %v451_v51 = vrot.slane %v446_v50, 4 }
 0x658   :  { %v1314_v52 = vpop.f32.mrf.mxu1 }
 0x659   :  { %v453_v53 = vadd.f32 %v451_v51, %v1683_v12 }
 0x65b   :  { %1418 = vtanh.f32 %v453_v53  ;;  %v1209_v55 = vmul.f32 -1.442695, %v453_v53 }
 0x65d   :  { %1420 = vpow2.f32 %v1209_v55 }
 0x668   :  { %v1419_v54 = vpop.eup %1418 }
 0x669   :  { %466 = vrot.lane.b32.xlu0 %v1419_v54, %s1559_s11 }
 0x66a   :  { %v1421_v56 = vpop.eup %1420 }
 0x66b   :  { %v457_v57 = vadd.f32 1.0, %v1421_v56 }
 0x66d   :  { %1422 = vrcp.f32 %v457_v57 }
 0x67a   :  { %v1423_v58 = vpop.eup %1422 }
 0x67b   :  { %v464_v62 = vmul.f32 %v1423_v58, %v462_v61 }
 0x6db   :  { %v467_v59 = vpop.permute.xlu0 %466 }
 0x6dc   :  { %v469_v60 = vmul.f32 %v1423_v58, %v467_v59 }
 0x6de   :  { %471 = vrot.lane.b32.xlu1 %v469_v60, %s1560_s3 }
 0x750   :  { %v472_v63 = vpop.permute.xlu1 %471 }
 0x751   :  { %v474_v1 = vadd.f32 %v472_v63, %v464_v62 }
 0x753   :  { %1424 = vtanh.f32 %v474_v1  ;;  %v569_v24 = vrot.slane %v474_v1, 6 }
 0x760   :  { %v1425_v3 = vpop.eup %1424 }
 0x761   :  { %477 = vrot.lane.b32.xlu0 %v1425_v3, %s1559_s11 }
 0x7d3   :  { %v478_v4 = vpop.permute.xlu0 %477 }
 0x7d4   :  { %v480_v8 = vmul.f32 %v1423_v58, %v478_v4 }
 0x7d6   :  { %v482_v9 = vrot.slane %v480_v8, 4 }
 0x7d8   :  { %483 = vrot.lane.b32.xlu1 %v482_v9, %s1560_s3 }
 0x84a   :  { %v484_v11 = vpop.permute.xlu1 %483 }
 0x84b   :  { %1324 = vmatmul.mubr.msk.f32.vlgmr.msra.gmra.mxu0 %vm169_vm3, %v484_v11 }
 0x84c   :  { %1338 = vmatpush3.msra.mxu0 %v1625_v2  ;;  %1345 = vmatprep.mubr.msk.f32.mxu0 %vm1558_vm0, %v1557_v0 }
 0x84d   :  { %1339 = vmatprep.subr.mxu0 %v1557_v0 }
 0x84e   :  { %1340 = vmatpush3.msra.mxu0 %v1637_v5 }
 0x84f   :  { %1341 = vmatprep.subr.mxu0 %v1557_v0 }
 0x850   :  { %1342 = vmatpush3.msra.mxu0 %v1643_v6 }
 0x851   :  { %1343 = vmatprep.subr.mxu0 %v1557_v0 }
 0x852   :  { %1344 = vmatpush3.msra.mxu0 %v1651_v7 }
 0x853   :  { %1359 = vmatprep.subr.mxu0 %v1557_v0 }
 0x90b   :  { %v553_v13 = vpop.f32.mrf.mxu0 }
 0x90c   :  { %v558_v14 = vrot.slane %v553_v13, 2 }
 0x90d   :  { %v1325_v15 = vpop.f32.mrf.mxu0 }
 0x90e   :  { %v560_v16 = vadd.f32 %v558_v14, %v1683_v12 }
 0x910   :  { %1426 = vtanh.f32 %v560_v16  ;;  %v1211_v18 = vmul.f32 -1.442695, %v560_v16 }
 0x912   :  { %1428 = vpow2.f32 %v1211_v18 }
 0x91d   :  { %v1427_v17 = vpop.eup %1426 }
 0x91e   :  { %573 = vrot.lane.b32.xlu0 %v1427_v17, %s1559_s11 }
 0x91f   :  { %v1429_v19 = vpop.eup %1428 }
 0x920   :  { %v564_v20 = vadd.f32 1.0, %v1429_v19 }
 0x922   :  { %1430 = vrcp.f32 %v564_v20 }
 0x92f   :  { %v1431_v21 = vpop.eup %1430 }
 0x930   :  { %v571_v25 = vmul.f32 %v1431_v21, %v569_v24 }
 0x990   :  { %v574_v22 = vpop.permute.xlu0 %573 }
 0x991   :  { %v576_v23 = vmul.f32 %v1431_v21, %v574_v22 }
 0x993   :  { %578 = vrot.lane.b32.xlu1 %v576_v23, %s1560_s3 }
 0xa05   :  { %v579_v26 = vpop.permute.xlu1 %578 }
 0xa06   :  { %v581_v27 = vadd.f32 %v579_v26, %v571_v25 }
 0xa08   :  { %1432 = vtanh.f32 %v581_v27  ;;  %v673_v42 = vrot.slane %v581_v27, 6 }
 0xa15   :  { %v1433_v12 = vpop.eup %1432 }
 0xa16   :  { %584 = vrot.lane.b32.xlu0 %v1433_v12, %s1559_s11 }
 0xa88   :  { %v585_v28 = vpop.permute.xlu0 %584 }
 0xa89   :  { %v587_v29 = vmul.f32 %v1431_v21, %v585_v28 }
 0xa8b   :  { %v589_v30 = vrot.slane %v587_v29, 6 }
 0xa8d   :  { %590 = vrot.lane.b32.xlu1 %v589_v30, %s1560_s3 }
 0xaff   :  { %v591_v31 = vpop.permute.xlu1 %590 }
 0xb00   :  { %1335 = vmatmul.mubr.msk.f32.vlgmr.msra.gmra.mxu1 %vm169_vm3, %v591_v31 }
 0xb01   :  { %1349 = vmatpush3.msra.mxu1 %v1625_v2  ;;  %1356 = vmatprep.mubr.msk.f32.mxu1 %vm1558_vm0, %v1557_v0 }
 0xb02   :  { %1350 = vmatprep.subr.mxu1 %v1557_v0 }
 0xb03   :  { %1351 = vmatpush3.msra.mxu1 %v1637_v5 }
 0xb04   :  { %1352 = vmatprep.subr.mxu1 %v1557_v0 }
 0xb05   :  { %1353 = vmatpush3.msra.mxu1 %v1643_v6 }
 0xb06   :  { %1354 = vmatprep.subr.mxu1 %v1557_v0 }
 0xb07   :  { %1355 = vmatpush3.msra.mxu1 %v1651_v7 }
 0xb08   :  { %1370 = vmatprep.subr.mxu1 %v1557_v0 }
 0xbc0   :  { %v660_v32 = vpop.f32.mrf.mxu1 }
 0xbc1   :  { %v664_v33 = vadd.f32 %v660_v32, %v1681_v10 }
 0xbc2   :  { %v1336_v34 = vpop.f32.mrf.mxu1 }
 0xbc3   :  { %1434 = vtanh.f32 %v664_v33  ;;  %v1213_v36 = vmul.f32 -1.442695, %v664_v33 }
 0xbc5   :  { %1436 = vpow2.f32 %v1213_v36 }
 0xbd0   :  { %v1435_v35 = vpop.eup %1434 }
 0xbd1   :  { %677 = vrot.lane.b32.xlu0 %v1435_v35, %s1559_s11 }
 0xbd2   :  { %v1437_v37 = vpop.eup %1436 }
 0xbd3   :  { %v668_v38 = vadd.f32 1.0, %v1437_v37 }
 0xbd5   :  { %1438 = vrcp.f32 %v668_v38 }
 0xbe2   :  { %v1439_v39 = vpop.eup %1438 }
 0xbe3   :  { %v675_v43 = vmul.f32 %v1439_v39, %v673_v42 }
 0xc43   :  { %v678_v40 = vpop.permute.xlu0 %677 }
 0xc44   :  { %v680_v41 = vmul.f32 %v1439_v39, %v678_v40 }
 0xc46   :  { %682 = vrot.lane.b32.xlu1 %v680_v41, %s1560_s3 }
 0xcb8   :  { %v683_v44 = vpop.permute.xlu1 %682 }
 0xcb9   :  { %v685_v45 = vadd.f32 %v683_v44, %v675_v43  ;;  %v1014_v43 = vld [vmem:[#allocation2 + $0x10] sm:$0xff]  ;;  %v1013_v44 = vld [vmem:[#allocation2 + $0x8] sm:$0xff] }
 0xcbb   :  { %1440 = vtanh.f32 %v685_v45 }
 0xcc8   :  { %v1441_v46 = vpop.eup %1440 }
 0xcc9   :  { %688 = vrot.lane.b32.xlu0 %v1441_v46, %s1559_s11 }
 0xd3b   :  { %v689_v47 = vpop.permute.xlu0 %688 }
 0xd3c   :  { %v691_v48 = vmul.f32 %v1439_v39, %v689_v47  ;;  %v1103_v47 = vld [vmem:[#allocation5 + $0x18] sm:$0xff] }
 0xd3e   :  { %693 = vrot.lane.b32.xlu1 %v691_v48, %s1560_s3 }
 0xdb0   :  { %v694_v49 = vpop.permute.xlu1 %693 }
 0xdb1   :  { %1346 = vmatmul.mubr.msk.f32.vlgmr.msra.gmra.mxu0 %vm169_vm3, %v694_v49 }
 0xdb2   :  { %1360 = vmatpush3.msra.mxu0 %v1625_v2  ;;  %1367 = vmatprep.mubr.msk.f32.mxu0 %vm1558_vm0, %v1557_v0 }
 0xdb3   :  { %1361 = vmatprep.subr.mxu0 %v1557_v0 }
 0xdb4   :  { %1362 = vmatpush3.msra.mxu0 %v1637_v5 }
 0xdb5   :  { %1363 = vmatprep.subr.mxu0 %v1557_v0 }
 0xdb6   :  { %1364 = vmatpush3.msra.mxu0 %v1643_v6 }
 0xdb7   :  { %1365 = vmatprep.subr.mxu0 %v1557_v0 }
 0xdb8   :  { %1366 = vmatpush3.msra.mxu0 %v1651_v7  ;;  %v779_v7 = vrot.slane %v685_v45, 6  ;;  %v1012_v45 = vld [vmem:[#allocation2] sm:$0xff] }
 0xdb9   :  { %1381 = vmatprep.subr.mxu0 %v1557_v0 }
 0xe71   :  { %v763_v50 = vpop.f32.mrf.mxu0 }
 0xe72   :  { %v768_v51 = vrot.slane %v763_v50, 6 }
 0xe73   :  { %v1347_v2 = vpop.f32.mrf.mxu0 }
 0xe74   :  { %v770_v52 = vadd.f32 %v768_v51, %v1681_v10  ;;  %v1102_v2 = vld [vmem:[#allocation5 + $0x10] sm:$0xff] }
 0xe76   :  { %1442 = vtanh.f32 %v770_v52  ;;  %v1215_v5 = vmul.f32 -1.442695, %v770_v52  ;;  %v1101_v52 = vld [vmem:[#allocation5 + $0x8] sm:$0xff] }
 0xe78   :  { %1444 = vpow2.f32 %v1215_v5  ;;  %v1220_v5 = vld [vmem:[%s1805_s5] ss:$0 sm:$0xff] }
 0xe83   :  { %v1443_v53 = vpop.eup %1442 }
 0xe84   :  { %783 = vrot.lane.b32.xlu0 %v1443_v53, %s1559_s11  ;;  %v1100_v53 = vld [vmem:[#allocation5] sm:$0xff] }
 0xe85   :  { %v1445_v54 = vpop.eup %1444 }
 0xe86   :  { %v774_v55 = vadd.f32 1.0, %v1445_v54 }
 0xe88   :  { %1446 = vrcp.f32 %v774_v55 }
 0xe95   :  { %v1447_v6 = vpop.eup %1446 }
 0xe96   :  { %v781_v58 = vmul.f32 %v1447_v6, %v779_v7 }
 0xef6   :  { %v784_v56 = vpop.permute.xlu0 %783 }
 0xef7   :  { %v786_v57 = vmul.f32 %v1447_v6, %v784_v56 }
 0xef9   :  { %788 = vrot.lane.b32.xlu1 %v786_v57, %s1560_s3  ;;  %v1222_v57 = vld [vmem:[#allocation7] ss:$0 sm:$0xff] }
 0xf6b   :  { %v789_v59 = vpop.permute.xlu1 %788 }
 0xf6c   :  { %v791_v60 = vadd.f32 %v789_v59, %v781_v58 }
 0xf6e   :  { %1448 = vtanh.f32 %v791_v60  ;;  %v886_v20 = vrot.slane %v791_v60, 6 }
 0xf7b   :  { %v1449_v61 = vpop.eup %1448 }
 0xf7c   :  { %794 = vrot.lane.b32.xlu0 %v1449_v61, %s1559_s11 }
 0xfee   :  { %v795_v62 = vpop.permute.xlu0 %794 }
 0xfef   :  { %v797_v63 = vmul.f32 %v1447_v6, %v795_v62 }
 0xff1   :  { %v799_v1 = vrot.slane %v797_v63, 2 }
 0xff3   :  { %800 = vrot.lane.b32.xlu1 %v799_v1, %s1560_s3 }
0x1065   :  { %v801_v3 = vpop.permute.xlu1 %800 }
0x1066   :  { %1357 = vmatmul.mubr.msk.f32.vlgmr.msra.gmra.mxu1 %vm169_vm3, %v801_v3 }
0x1067   :  { %1378 = vmatprep.mubr.msk.f32.mxu1 %vm1558_vm0, %v1557_v0 }
0x1126   :  { %v870_v4 = vpop.f32.mrf.mxu1 }
0x1127   :  { %v875_v8 = vrot.slane %v870_v4, 4 }
0x1128   :  { %v1358_v9 = vpop.f32.mrf.mxu1 }
0x1129   :  { %v877_v11 = vadd.f32 %v875_v8, %v1681_v10 }
0x112b   :  { %1450 = vtanh.f32 %v877_v11  ;;  %v1217_v14 = vmul.f32 -1.442695, %v877_v11 }
0x112d   :  { %1452 = vpow2.f32 %v1217_v14 }
0x1138   :  { %v1451_v13 = vpop.eup %1450 }
0x1139   :  { %890 = vrot.lane.b32.xlu0 %v1451_v13, %s1559_s11 }
0x113a   :  { %v1453_v15 = vpop.eup %1452 }
0x113b   :  { %v881_v16 = vadd.f32 1.0, %v1453_v15 }
0x113d   :  { %1454 = vrcp.f32 %v881_v16 }
0x114a   :  { %v1455_v17 = vpop.eup %1454 }
0x114b   :  { %v888_v21 = vmul.f32 %v1455_v17, %v886_v20 }
0x11ab   :  { %v891_v18 = vpop.permute.xlu0 %890 }
0x11ac   :  { %v893_v19 = vmul.f32 %v1455_v17, %v891_v18 }
0x11ae   :  { %895 = vrot.lane.b32.xlu1 %v893_v19, %s1560_s3 }
0x1220   :  { %v896_v22 = vpop.permute.xlu1 %895 }
0x1221   :  { %v898_v23 = vadd.f32 %v896_v22, %v888_v21 }
0x1223   :  { %1456 = vtanh.f32 %v898_v23  ;;  %v993_v39 = vrot.slane %v898_v23, 6 }
0x1230   :  { %v1457_v24 = vpop.eup %1456 }
0x1231   :  { %901 = vrot.lane.b32.xlu0 %v1457_v24, %s1559_s11 }
0x12a3   :  { %v902_v25 = vpop.permute.xlu0 %901 }
0x12a4   :  { %v904_v26 = vmul.f32 %v1455_v17, %v902_v25 }
0x12a6   :  { %v906_v27 = vrot.slane %v904_v26, 4 }
0x12a8   :  { %907 = vrot.lane.b32.xlu1 %v906_v27, %s1560_s3 }
0x131a   :  { %v908_v12 = vpop.permute.xlu1 %907 }
0x131b   :  { %1368 = vmatmul.mubr.msk.f32.vlgmr.msra.gmra.mxu0 %vm169_vm3, %v908_v12 }
0x131c   :  { %1389 = vmatprep.mubr.msk.f32.mxu0 %vm1558_vm0, %v1557_v0  ;;  %1382 = vmatpush3.msra.mxu0 %v1103_v47 }
0x131d   :  { %1383 = vmatprep.subr.mxu0 %v1557_v0 }
0x131e   :  { %1384 = vmatpush3.msra.mxu0 %v1102_v2 }
0x131f   :  { %1385 = vmatprep.subr.mxu0 %v1557_v0 }
0x1320   :  { %1386 = vmatpush3.msra.mxu0 %v1101_v52 }
0x1321   :  { %1387 = vmatprep.subr.mxu0 %v1557_v0 }
0x1322   :  { %1388 = vmatpush3.msra.mxu0 %v1100_v53 }
0x13db   :  { %v977_v28 = vpop.f32.mrf.mxu0 }
0x13dc   :  { %v982_v29 = vrot.slane %v977_v28, 2 }
0x13dd   :  { %v1369_v30 = vpop.f32.mrf.mxu0 }
0x13de   :  { %v984_v31 = vadd.f32 %v982_v29, %v1681_v10  ;;  %v1015_v10 = vld [vmem:[#allocation2 + $0x18] sm:$0xff] }
0x13df   :  { %1371 = vmatpush3.msra.mxu1 %v1015_v10 }
0x13e0   :  { %1458 = vtanh.f32 %v984_v31  ;;  %v1219_v33 = vmul.f32 -1.442695, %v984_v31  ;;  %1372 = vmatprep.subr.mxu1 %v1557_v0 }
0x13e1   :  { %1373 = vmatpush3.msra.mxu1 %v1014_v43 }
0x13e2   :  { %1460 = vpow2.f32 %v1219_v33  ;;  %1374 = vmatprep.subr.mxu1 %v1557_v0 }
0x13e3   :  { %1375 = vmatpush3.msra.mxu1 %v1013_v44 }
0x13e4   :  { %1376 = vmatprep.subr.mxu1 %v1557_v0 }
0x13e5   :  { %1377 = vmatpush3.msra.mxu1 %v1012_v45 }
0x13ed   :  { %v1459_v32 = vpop.eup %1458 }
0x13ee   :  { %997 = vrot.lane.b32.xlu0 %v1459_v32, %s1559_s11 }
0x13ef   :  { %v1461_v34 = vpop.eup %1460 }
0x13f0   :  { %v988_v35 = vadd.f32 1.0, %v1461_v34 }
0x13f2   :  { %1462 = vrcp.f32 %v988_v35 }
0x13ff   :  { %v1463_v36 = vpop.eup %1462 }
0x1400   :  { %v995_v40 = vmul.f32 %v1463_v36, %v993_v39 }
0x1460   :  { %v998_v37 = vpop.permute.xlu0 %997 }
0x1461   :  { %v1000_v38 = vmul.f32 %v1463_v36, %v998_v37 }
0x1463   :  { %1002 = vrot.lane.b32.xlu1 %v1000_v38, %s1560_s3 }
0x14d5   :  { %v1003_v41 = vpop.permute.xlu1 %1002 }
0x14d6   :  { %v1005_v42 = vadd.f32 %v1003_v41, %v995_v40 }
0x14d8   :  { %1464 = vtanh.f32 %v1005_v42 }
0x14e5   :  { %v1465_v46 = vpop.eup %1464 }
0x14e6   :  { %1008 = vrot.lane.b32.xlu0 %v1465_v46, %s1559_s11 }
0x1558   :  { %v1009_v48 = vpop.permute.xlu0 %1008 }
0x1559   :  { %v1011_v49 = vmul.f32 %v1463_v36, %v1009_v48 }
0x155b   :  { %v1024_v50 = vrot.slane %v1011_v49, 6 }
0x155d   :  { %1025 = vrot.lane.b32.xlu1 %v1024_v50, %s1560_s3 }
0x15cf   :  { %v1026_v51 = vpop.permute.xlu1 %1025 }
0x15d0   :  { %1379 = vmatmul.mubr.msk.f32.vlgmr.msra.gmra.mxu1 %vm169_vm3, %v1026_v51 }
0x1690   :  { %v1095_v54 = vpop.f32.mrf.mxu1 }
0x1691   :  { %v1096_v55 = vadd.f32 %v1220_v5, %v1095_v54 }
0x1692   :  { %v1380_v6 = vpop.f32.mrf.mxu1 }
0x1693   :  { %v1099_v56 = vmax.f32 %v1096_v55, 0.0 }
0x1695   :  { %1390 = vmatmul.mubr.msk.f32.vlgmr.msra.gmra.mxu0 %vm169_vm3, %v1099_v56 }
0x1755   :  { %v1180_v7 = vpop.f32.mrf.mxu0 }
0x1756   :  { %v1181_v58 = vadd.f32 %v1222_v57, %v1180_v7 }
0x1757   :  { %v1391_v59 = vpop.f32.mrf.mxu0 }
0x1758   :  { %1184 = vst [vmem:[#allocation8] sm:$0x3] %v1181_v58 }
0x1759   :  { %1537 = shalt.err (!%p1534_p5)
}
0x175a   :  { %1194 = dma.vmem_to_hbm [thread:$0]  %s1192_s15, 32, %s1808_s8, [#allocation4]  }
0x175b   :  { %1550 = dma.done.wait [#allocation4], 32  }
0x175c   :  { %1551 = vsyncadd [#allocation4], 4294967264 }
0x175d   :  { %1198 = vsyncpa [#allocation3], 1 }
0x175e   :  { %1199 = vsyncpa [#allocation6], 1 }
0x175f   :  { %1200 = vsyncpa [#allocation4], 1 }

</bundles_post_ra>
